<compile_context>
chip_gen: v6e
topology: v6e:2x2x1
jax: 0.10.0
libtpu: 0.0.40
codegen_flags: <defaults>
</compile_context>

<pallas_src>
import functools

import jax
import jax.numpy as jnp
from jax.experimental import pallas as pl
from jax.experimental.pallas import tpu as pltpu


def _triplet_semihard_kernel(
    labels_s, counts_s, order_s,                         # scalar prefetch (SMEM)
    lab_col_ref, sq_col_ref, valid_col_ref, emb_ref,     # unblocked VMEM residents
    lab_blk_ref, sq_blk_ref, valid_blk_ref,              # per-block (1, TM) tiles
    loss_ref,                                            # (1, 1, 128) partial output
    pt_ref,                                              # (N, TM) scratch: pdist[a, k]^T
    *, margin, block_rows, n_pad, squared, padded):
    i = pl.program_id(0)
    tm = block_rows

    # ---------------- prologue: transposed pairwise-distance slab ----------------
    row_start = pl.multiple_of(i * tm, tm)
    e_blk = emb_ref[pl.ds(row_start, tm), :]                   # (TM, C) block anchors
    gram_t = jax.lax.dot_general(                              # (N, TM) = E @ E_blk^T (MXU)
        emb_ref[...], e_blk, (((1,), (1,)), ((), ())),
        precision=jax.lax.Precision.HIGHEST,                   # TODO(synk): HIGH/bf16 on v5e
        preferred_element_type=jnp.float32)

    sq_col = sq_col_ref[...]                                   # (N, 1)  ||e_k||^2 (hoisted)
    sq_blk = sq_blk_ref[...]                                   # (1, TM) ||e_a||^2 (hoisted)
    pd_sq = sq_col + sq_blk - 2.0 * gram_t                     # PT[k, a] = pdist[a, k]

    k_col = jax.lax.broadcasted_iota(jnp.int32, (n_pad, 1), 0)
    a_glob = jax.lax.broadcasted_iota(jnp.int32, (1, tm), 1) + i * tm
    diag = k_col == a_glob                                     # (N, TM) via cheap broadcast
    bad = jnp.logical_or(pd_sq <= 0.0, diag)
    if squared:
        pd_t = jnp.where(bad, 0.0, pd_sq)
    else:
        pd_t = jnp.where(bad, 0.0, jnp.sqrt(jnp.maximum(pd_sq, 1e-16)))

    lab_col = lab_col_ref[...]                                 # (N, 1)  int32
    lab_blk = lab_blk_ref[...]                                 # (1, TM) int32
    adj_not_t = lab_col != lab_blk                             # negatives (transposed)
    if padded:
        # padded rows must never act as negatives
        adj_not_t = jnp.logical_and(adj_not_t, valid_col_ref[...] > 0.5)
    adj_not_t_f = adj_not_t.astype(jnp.float32)

    # per-anchor fallback negative: masked_maximum over negatives (always finite)
    col_min = jnp.min(pd_t, axis=0, keepdims=True)             # (1, TM)
    neg_inside = (jnp.max((pd_t - col_min) * adj_not_t_f, axis=0, keepdims=True)
                  + col_min)                                   # (1, TM)

    # hoisted negative mask: the hot loop needs a single compare+select + min
    pd_neg = jnp.where(adj_not_t, pd_t, jnp.inf)               # (N, TM)

    pt_ref[...] = pd_t                                         # loop reads pdist[:, b] rows

    # --------- semi-hard mining: only positives b that touch this block ----------
    def body(t, loss_acc):
        b = order_s[i * n_pad + t]                             # SMEM scalar: positive index
        d_b = pt_ref[pl.ds(b, 1), :]                           # (1, TM) = pdist[a, b]
        cand = jnp.where(pd_neg > d_b, pd_neg, jnp.inf)        # negatives farther than d_b
        neg_cand = jnp.min(cand, axis=0, keepdims=True)        # (1, TM)
        has_semi = neg_cand < jnp.inf
        semi = jnp.where(has_semi, neg_cand, neg_inside)       # always finite
        lab_b = labels_s[b]                                    # SMEM scalar label
        mp_b = jnp.logical_and(lab_b == lab_blk, a_glob != b).astype(jnp.float32)
        clipped = jnp.maximum((margin + d_b - semi) * mp_b, 0.0)
        return loss_acc + clipped                              # (1, TM) VPU accumulate

    n_contrib = counts_s[i]                                    # dynamic trip count
    loss_acc = jax.lax.fori_loop(0, n_contrib, body,
                                 jnp.zeros((1, tm), jnp.float32))
    if padded:
        loss_acc = loss_acc * valid_blk_ref[...]               # zero padded anchor lanes
    loss_11 = jnp.sum(loss_acc, axis=1, keepdims=True)         # (1, 1)

    loss_ref[...] = jnp.broadcast_to(loss_11.reshape(1, 1, 1), (1, 1, 128))


def _vmem_budget_bytes():
    """Generation-aware scoped-VMEM budget (v7x: 64 MiB physical; v5e/v6e: 128 MiB)."""
    try:
        cap = int(pltpu.get_tpu_info().vmem_capacity_bytes)
    except Exception:
        cap = 64 * 1024 * 1024
    return min(int(cap * 3 // 4), 100 * 1024 * 1024)


def _choose_tiling(n, c, budget):
    """Returns (tm, n_pad); keeps blocks (8,128)-friendly (or full-extent) and
    prefers >=2 blocks so megacore chips get both cores busy."""
    if n <= 128:
        return n, n
    candidates = []
    for tm in (256, 128):
        n_pad = pl.cdiv(n, tm) * tm
        # resident embeddings + pdist scratch + ~3 live (N,TM) slab temporaries + misc
        need = n_pad * c * 4 + 4 * n_pad * tm * 4 + (2 << 20)
        if need <= budget:
            candidates.append((tm, n_pad))
    if not candidates:
        return 128, pl.cdiv(n, 128) * 128
    for tm, n_pad in candidates:
        if n_pad // tm >= 2:
            return tm, n_pad
    return candidates[-1]


def triplet_semihard_loss(embeddings, target, margin=1.0, squared=True):
    """embeddings: (N, C) float; target: (N,) int labels. Returns scalar loss."""
    n, c = embeddings.shape
    emb = embeddings.astype(jnp.float32)
    labels = target.astype(jnp.int32)

    budget = _vmem_budget_bytes()
    tm, n_pad = _choose_tiling(n, c, budget)
    num_blocks = n_pad // tm
    pad = n_pad - n
    padded = pad > 0

    if padded:
        emb_p = jnp.concatenate([emb, jnp.zeros((pad, c), jnp.float32)], axis=0)
        lab_p = jnp.concatenate([labels, jnp.full((pad,), -1, jnp.int32)], axis=0)
        valid = jnp.concatenate([jnp.ones((n,), jnp.float32),
                                 jnp.zeros((pad,), jnp.float32)], axis=0)
    else:
        emb_p, lab_p, valid = emb, labels, jnp.ones((n,), jnp.float32)

    sq = jnp.sum(emb_p * emb_p, axis=1)                        # ||e||^2 hoisted out of kernel

    # compacted list of positive indices b that can contribute to each anchor block
    blk_lab = lab_p.reshape(num_blocks, tm)
    blk_valid = valid.reshape(num_blocks, tm) > 0.0
    glob_a = jnp.arange(n_pad, dtype=jnp.int32).reshape(num_blocks, tm)
    same = blk_lab[:, :, None] == lab_p[None, None, :]
    not_self = glob_a[:, :, None] != jnp.arange(n_pad, dtype=jnp.int32)[None, None, :]
    contributes = (jnp.any(same & not_self & blk_valid[:, :, None], axis=1)
                   & (valid[None, :] > 0.0))                   # (num_blocks, n_pad)
    counts = jnp.sum(contributes, axis=1).astype(jnp.int32)    # (num_blocks,)
    order = jnp.argsort((~contributes).astype(jnp.int32), axis=1).astype(jnp.int32)
    order_flat = order.reshape(-1)                             # contributing b's first

    kernel = functools.partial(
        _triplet_semihard_kernel, margin=float(margin), block_rows=tm,
        n_pad=n_pad, squared=bool(squared), padded=padded)

    resident = pl.BlockSpec(memory_space=pltpu.MemorySpace.VMEM)  # single-buffered, whole array
    loss_parts = pl.pallas_call(
        kernel,
        out_shape=jax.ShapeDtypeStruct((num_blocks, 1, 128), jnp.float32),
        grid_spec=pltpu.PrefetchScalarGridSpec(
            num_scalar_prefetch=3,            # labels, per-block counts, compacted b order
            grid=(num_blocks,),
            in_specs=[
                resident,                                        # labels column   (N, 1)
                resident,                                        # ||e||^2 column  (N, 1)
                resident,                                        # validity column (N, 1)
                resident,                                        # embeddings      (N, C)
                pl.BlockSpec((1, tm), lambda i, *_: (0, i)),     # block labels    (1, TM)
                pl.BlockSpec((1, tm), lambda i, *_: (0, i)),     # block ||e||^2   (1, TM)
                pl.BlockSpec((1, tm), lambda i, *_: (0, i)),     # block validity  (1, TM)
            ],
            out_specs=pl.BlockSpec((1, 1, 128), lambda i, *_: (i, 0, 0)),
            scratch_shapes=[pltpu.VMEM((n_pad, tm), jnp.float32)],
        ),
        compiler_params=pltpu.CompilerParams(
            dimension_semantics=("parallel",),
            vmem_limit_bytes=budget,
        ),
    )(lab_p, counts, order_flat,
      lab_p.reshape(n_pad, 1), sq.reshape(n_pad, 1), valid.reshape(n_pad, 1), emb_p,
      lab_p.reshape(1, n_pad), sq.reshape(1, n_pad), valid.reshape(1, n_pad))

    num_pos = (jnp.sum(labels[:, None] == labels[None, :]) - n).astype(jnp.float32)
    return jnp.sum(loss_parts[:, 0, 0]) / num_pos


def triplet_semihard_loss_ref(embeddings, target, margin=1.0):
    """Plain-JAX mirror of the PyTorch module (for correctness checking)."""
    e = embeddings.astype(jnp.float32)
    labels = target.astype(jnp.int32)[:, None]
    n = e.shape[0]
    sq = jnp.sum(e ** 2, axis=1, keepdims=True)
    pd_sq = sq + sq.T - 2.0 * jnp.dot(e, e.T, precision=jax.lax.Precision.HIGHEST)
    err = pd_sq <= 0.0
    pd = jnp.maximum(pd_sq, 0.0)
    pd = pd * (~err).astype(jnp.float32)
    pd = pd * (1.0 - jnp.eye(n, dtype=jnp.float32))
    adjacency = labels == labels.T
    adjacency_not = ~adjacency
    pd_tile = jnp.tile(pd, (n, 1))
    mask = jnp.tile(adjacency_not, (n, 1)) & (pd_tile > jnp.reshape(pd.T, (-1, 1)))
    mask_f = mask.astype(jnp.float32)
    mask_final = jnp.reshape(jnp.sum(mask_f, axis=1, keepdims=True) > 0.0, (n, n)).T
    axis_max = jnp.max(pd_tile, axis=1, keepdims=True)
    neg_out = (jnp.min((pd_tile - axis_max) * mask_f, axis=1, keepdims=True)
               + axis_max).reshape(n, n).T
    adjn_f = adjacency_not.astype(jnp.float32)
    axis_min = jnp.min(pd, axis=1, keepdims=True)
    neg_in = jnp.tile(jnp.max((pd - axis_min) * adjn_f, axis=1, keepdims=True) + axis_min,
                      (1, n))
    semi = jnp.where(mask_final, neg_out, neg_in)
    loss_mat = margin + pd - semi
    mask_pos = adjacency.astype(jnp.float32) - jnp.eye(n, dtype=jnp.float32)
    num_pos = jnp.sum(mask_pos)
    return jnp.sum(jnp.maximum(loss_mat * mask_pos, 0.0)) / num_pos


if __name__ == "__main__":
    key = jax.random.PRNGKey(0)

    # Small canonical case (single full-extent block).
    N, C = 8, 32
    embeddings = jax.random.normal(key, (N, C), dtype=jnp.float32)
    target = jnp.array([0, 0, 1, 1, 2, 2, 3, 3], dtype=jnp.int32)
    loss = jax.block_until_ready(triplet_semihard_loss(embeddings, target, margin=1.0))
    ref = triplet_semihard_loss_ref(embeddings, target, margin=1.0)
    assert jnp.allclose(loss, ref, rtol=1e-3, atol=1e-3), (loss, ref)

    # Ragged multi-block case (exercises padding, >=2 blocks, positive-index compaction).
    N2, C2 = 192, 16
    emb2 = jax.random.normal(jax.random.PRNGKey(0), (N2, C2), dtype=jnp.float32)
    target2 = (jnp.arange(N2, dtype=jnp.int32) // 24)
    loss2 = jax.block_until_ready(triplet_semihard_loss(emb2, target2, margin=1.0))
    ref2 = triplet_semihard_loss_ref(emb2, target2, margin=1.0)
    assert jnp.allclose(loss2, ref2, rtol=1e-3, atol=1e-3), (loss2, ref2)

    print("KERNEL_OK")
</pallas_src>

<mosaic_0001>
module attributes {stable_mosaic.version = 11 : i64} {
  func.func @_triplet_semihard_kernel(%arg0: i32, %arg1: memref<8xi32, #tpu.memory_space<smem>>, %arg2: memref<1xi32, #tpu.memory_space<smem>>, %arg3: memref<8xi32, #tpu.memory_space<smem>>, %arg4: memref<8x1xi32, #tpu.memory_space<vmem>>, %arg5: memref<8x1xf32, #tpu.memory_space<vmem>>, %arg6: memref<8x1xf32, #tpu.memory_space<vmem>>, %arg7: memref<8x32xf32, #tpu.memory_space<vmem>>, %arg8: memref<1x8xi32, #tpu.memory_space<vmem>>, %arg9: memref<1x8xf32, #tpu.memory_space<vmem>>, %arg10: memref<1x8xf32, #tpu.memory_space<vmem>>, %arg11: memref<1x1x128xf32, #tpu.memory_space<vmem>>, %arg12: memref<8x8xf32, #tpu.memory_space<vmem>>) attributes {dimension_semantics = [#tpu.dimension_semantics<parallel>], iteration_bounds = array<i64: 1>, scalar_prefetch = 3 : i64, scratch_operands = 1 : i64, tpu.core_type = #tpu.core_type<tc>, window_params = [{pipeline_mode = #tpu.pipeline_mode<synchronous>, transform_indices = @transform_0, window_bounds = array<i64: 8, 1>}, {pipeline_mode = #tpu.pipeline_mode<synchronous>, transform_indices = @transform_1, window_bounds = array<i64: 8, 1>}, {pipeline_mode = #tpu.pipeline_mode<synchronous>, transform_indices = @transform_2, window_bounds = array<i64: 8, 1>}, {pipeline_mode = #tpu.pipeline_mode<synchronous>, transform_indices = @transform_3, window_bounds = array<i64: 8, 32>}, {transform_indices = @transform_4, window_bounds = array<i64: 1, 8>}, {transform_indices = @transform_5, window_bounds = array<i64: 1, 8>}, {transform_indices = @transform_6, window_bounds = array<i64: 1, 8>}, {transform_indices = @transform_7, window_bounds = array<i64: 1, 1, 128>}]} {
    %c8_i32 = arith.constant 8 : i32
    %0 = arith.muli %arg0, %c8_i32 : i32
    %1 = tpu.assume_multiple %0, 8 : i32
    %2 = arith.index_cast %1 : i32 to index
    %c0 = arith.constant 0 : index
    %3 = vector.load %arg7[%2, %c0] : memref<8x32xf32, #tpu.memory_space<vmem>>, vector<8x32xf32>
    %c0_0 = arith.constant 0 : index
    %c0_1 = arith.constant 0 : index
    %4 = vector.load %arg7[%c0_0, %c0_1] : memref<8x32xf32, #tpu.memory_space<vmem>>, vector<8x32xf32>
    %cst = arith.constant dense<0.000000e+00> : vector<8x8xf32>
    %5 = tpu.matmul %4, %3, %cst {dimension_numbers = #tpu.dot_dimension_numbers<[1], [1], [0], [0], [0, 0, 1, 0], [], []>, precision = #tpu.contract_precision<fp32>} : vector<8x32xf32>, vector<8x32xf32>, vector<8x8xf32> -> vector<8x8xf32>
    %c0_2 = arith.constant 0 : index
    %c0_3 = arith.constant 0 : index
    %6 = vector.load %arg5[%c0_2, %c0_3] : memref<8x1xf32, #tpu.memory_space<vmem>>, vector<8x1xf32>
    %c0_4 = arith.constant 0 : index
    %c0_5 = arith.constant 0 : index
    %7 = vector.load %arg9[%c0_4, %c0_5] : memref<1x8xf32, #tpu.memory_space<vmem>>, vector<1x8xf32>
    %8 = vector.broadcast %6 : vector<8x1xf32> to vector<8x8xf32>
    %9 = vector.broadcast %7 : vector<1x8xf32> to vector<8x8xf32>
    %10 = arith.addf %8, %9 : vector<8x8xf32>
    %cst_6 = arith.constant 2.000000e+00 : f32
    %11 = vector.broadcast %cst_6 : f32 to vector<8x8xf32>
    %12 = arith.mulf %11, %5 : vector<8x8xf32>
    %13 = arith.subf %10, %12 : vector<8x8xf32>
    %14 = tpu.iota {dimensions = array<i32: 0>} : vector<8x1xi32>
    %15 = tpu.iota {dimensions = array<i32: 1>} : vector<1x8xi32>
    %c8_i32_7 = arith.constant 8 : i32
    %16 = arith.muli %arg0, %c8_i32_7 : i32
    %17 = vector.broadcast %16 : i32 to vector<1x8xi32>
    %18 = arith.addi %15, %17 : vector<1x8xi32>
    %19 = vector.broadcast %14 : vector<8x1xi32> to vector<8x8xi32>
    %20 = vector.broadcast %18 : vector<1x8xi32> to vector<8x8xi32>
    %21 = arith.cmpi eq, %19, %20 : vector<8x8xi32>
    %cst_8 = arith.constant 0.000000e+00 : f32
    %22 = vector.broadcast %cst_8 : f32 to vector<8x8xf32>
    %23 = arith.cmpf ole, %13, %22 : vector<8x8xf32>
    %24 = arith.ori %23, %21 : vector<8x8xi1>
    %cst_9 = arith.constant 0.000000e+00 : f32
    %25 = vector.broadcast %cst_9 : f32 to vector<8x8xf32>
    %26 = arith.select %24, %25, %13 : vector<8x8xi1>, vector<8x8xf32>
    %c0_10 = arith.constant 0 : index
    %c0_11 = arith.constant 0 : index
    %27 = vector.load %arg4[%c0_10, %c0_11] : memref<8x1xi32, #tpu.memory_space<vmem>>, vector<8x1xi32>
    %c0_12 = arith.constant 0 : index
    %c0_13 = arith.constant 0 : index
    %28 = vector.load %arg8[%c0_12, %c0_13] : memref<1x8xi32, #tpu.memory_space<vmem>>, vector<1x8xi32>
    %29 = vector.broadcast %27 : vector<8x1xi32> to vector<8x8xi32>
    %30 = vector.broadcast %28 : vector<1x8xi32> to vector<8x8xi32>
    %31 = arith.cmpi ne, %29, %30 : vector<8x8xi32>
    %32 = arith.extui %31 : vector<8x8xi1> to vector<8x8xi32>
    %33 = arith.sitofp %32 : vector<8x8xi32> to vector<8x8xf32>
    %cst_14 = arith.constant dense<0x7F800000> : vector<8xf32>
    %34 = vector.multi_reduction <minimumf>, %26, %cst_14 [0] : vector<8x8xf32> to vector<8xf32>
    %35 = vector.shape_cast %34 : vector<8xf32> to vector<1x8xf32>
    %36 = vector.broadcast %35 : vector<1x8xf32> to vector<8x8xf32>
    %37 = arith.subf %26, %36 : vector<8x8xf32>
    %38 = arith.mulf %37, %33 : vector<8x8xf32>
    %cst_15 = arith.constant dense<0xFF800000> : vector<8xf32>
    %39 = vector.multi_reduction <maximumf>, %38, %cst_15 [0] : vector<8x8xf32> to vector<8xf32>
    %40 = vector.shape_cast %39 : vector<8xf32> to vector<1x8xf32>
    %41 = arith.addf %40, %35 : vector<1x8xf32>
    %cst_16 = arith.constant 0x7F800000 : f32
    %42 = vector.broadcast %cst_16 : f32 to vector<8x8xf32>
    %43 = arith.select %31, %26, %42 : vector<8x8xi1>, vector<8x8xf32>
    %c0_17 = arith.constant 0 : index
    %c0_18 = arith.constant 0 : index
    %44 = vector.load %arg12[%c0_17, %c0_18] : memref<8x8xf32, #tpu.memory_space<vmem>>, vector<8x8xf32>
    tpu.vector_store %arg12[%c0_17, %c0_18], %26 {strides = array<i32>} : memref<8x8xf32, #tpu.memory_space<vmem>>, vector<8x8xf32>,
    %45 = arith.index_cast %arg0 : i32 to index
    %46 = memref.load %arg2[%45] : memref<1xi32, #tpu.memory_space<smem>>
    %cst_19 = arith.constant 0.000000e+00 : f32
    %47 = vector.broadcast %cst_19 : f32 to vector<1x8xf32>
    %c0_i32 = arith.constant 0 : i32
    %48 = arith.subi %46, %c0_i32 : i32
    %49 = arith.addi %c0_i32, %48 : i32
    %c1_i32 = arith.constant 1 : i32
    %50 = scf.for %arg13 = %c0_i32 to %49 step %c1_i32 iter_args(%arg14 = %47) -> (vector<1x8xf32>)  : i32 {
      %c8_i32_24 = arith.constant 8 : i32
      %57 = arith.muli %arg0, %c8_i32_24 : i32
      %58 = arith.addi %57, %arg13 : i32
      %59 = arith.index_cast %58 : i32 to index
      %60 = memref.load %arg3[%59] : memref<8xi32, #tpu.memory_space<smem>>
      %61 = arith.index_cast %60 : i32 to index
      %c0_25 = arith.constant 0 : index
      %62 = vector.load %arg12[%61, %c0_25] : memref<8x8xf32, #tpu.memory_space<vmem>>, vector<1x8xf32>
      %63 = vector.broadcast %62 : vector<1x8xf32> to vector<8x8xf32>
      %64 = arith.cmpf ogt, %43, %63 : vector<8x8xf32>
      %cst_26 = arith.constant 0x7F800000 : f32
      %65 = vector.broadcast %cst_26 : f32 to vector<8x8xf32>
      %66 = arith.select %64, %43, %65 : vector<8x8xi1>, vector<8x8xf32>
      %cst_27 = arith.constant dense<0x7F800000> : vector<8xf32>
      %67 = vector.multi_reduction <minimumf>, %66, %cst_27 [0] : vector<8x8xf32> to vector<8xf32>
      %68 = vector.shape_cast %67 : vector<8xf32> to vector<1x8xf32>
      %cst_28 = arith.constant 0x7F800000 : f32
      %69 = vector.broadcast %cst_28 : f32 to vector<1x8xf32>
      %70 = arith.cmpf olt, %68, %69 : vector<1x8xf32>
      %71 = arith.select %70, %68, %41 : vector<1x8xi1>, vector<1x8xf32>
      %72 = arith.index_cast %60 : i32 to index
      %73 = memref.load %arg1[%72] : memref<8xi32, #tpu.memory_space<smem>>
      %74 = vector.broadcast %73 : i32 to vector<1x8xi32>
      %75 = arith.cmpi eq, %74, %28 : vector<1x8xi32>
      %76 = vector.broadcast %60 : i32 to vector<1x8xi32>
      %77 = arith.cmpi ne, %18, %76 : vector<1x8xi32>
      %78 = arith.andi %75, %77 : vector<1x8xi1>
      %79 = arith.extui %78 : vector<1x8xi1> to vector<1x8xi32>
      %80 = arith.sitofp %79 : vector<1x8xi32> to vector<1x8xf32>
      %cst_29 = arith.constant 1.000000e+00 : f32
      %81 = vector.broadcast %cst_29 : f32 to vector<1x8xf32>
      %82 = arith.addf %81, %62 : vector<1x8xf32>
      %83 = arith.subf %82, %71 : vector<1x8xf32>
      %84 = arith.mulf %83, %80 : vector<1x8xf32>
      %cst_30 = arith.constant 0.000000e+00 : f32
      %85 = vector.broadcast %cst_30 : f32 to vector<1x8xf32>
      %86 = arith.maximumf %84, %85 : vector<1x8xf32>
      %87 = arith.addf %arg14, %86 : vector<1x8xf32>
      scf.yield %87 : vector<1x8xf32>
    }
    %cst_20 = arith.constant dense<0.000000e+00> : vector<1xf32>
    %51 = vector.multi_reduction <add>, %50, %cst_20 [1] : vector<1x8xf32> to vector<1xf32>
    %52 = vector.shape_cast %51 : vector<1xf32> to vector<1x1xf32>
    %53 = vector.shape_cast %52 : vector<1x1xf32> to vector<1x1x1xf32>
    %54 = vector.shape_cast %53 : vector<1x1x1xf32> to vector<1x1x1xf32>
    %55 = vector.broadcast %54 : vector<1x1x1xf32> to vector<1x1x128xf32>
    %c0_21 = arith.constant 0 : index
    %c0_22 = arith.constant 0 : index
    %c0_23 = arith.constant 0 : index
    %56 = vector.load %arg11[%c0_21, %c0_22, %c0_23] : memref<1x1x128xf32, #tpu.memory_space<vmem>>, vector<1x1x128xf32>
    tpu.vector_store %arg11[%c0_21, %c0_22, %c0_23], %55 {strides = array<i32>} : memref<1x1x128xf32, #tpu.memory_space<vmem>>, vector<1x1x128xf32>,
    return
  }
  func.func @transform_0(%arg0: i32, %arg1: memref<8xi32, #tpu.memory_space<smem>>, %arg2: memref<1xi32, #tpu.memory_space<smem>>, %arg3: memref<8xi32, #tpu.memory_space<smem>>) -> (i32, i32) {
    %c0_i32 = arith.constant 0 : i32
    %c0_i32_0 = arith.constant 0 : i32
    %c0_i32_1 = arith.constant 0 : i32
    return %c0_i32, %c0_i32_0 : i32, i32
  }
  func.func @transform_1(%arg0: i32, %arg1: memref<8xi32, #tpu.memory_space<smem>>, %arg2: memref<1xi32, #tpu.memory_space<smem>>, %arg3: memref<8xi32, #tpu.memory_space<smem>>) -> (i32, i32) {
    %c0_i32 = arith.constant 0 : i32
    %c0_i32_0 = arith.constant 0 : i32
    %c0_i32_1 = arith.constant 0 : i32
    return %c0_i32, %c0_i32_0 : i32, i32
  }
  func.func @transform_2(%arg0: i32, %arg1: memref<8xi32, #tpu.memory_space<smem>>, %arg2: memref<1xi32, #tpu.memory_space<smem>>, %arg3: memref<8xi32, #tpu.memory_space<smem>>) -> (i32, i32) {
    %c0_i32 = arith.constant 0 : i32
    %c0_i32_0 = arith.constant 0 : i32
    %c0_i32_1 = arith.constant 0 : i32
    return %c0_i32, %c0_i32_0 : i32, i32
  }
  func.func @transform_3(%arg0: i32, %arg1: memref<8xi32, #tpu.memory_space<smem>>, %arg2: memref<1xi32, #tpu.memory_space<smem>>, %arg3: memref<8xi32, #tpu.memory_space<smem>>) -> (i32, i32) {
    %c0_i32 = arith.constant 0 : i32
    %c0_i32_0 = arith.constant 0 : i32
    %c0_i32_1 = arith.constant 0 : i32
    return %c0_i32, %c0_i32_0 : i32, i32
  }
  func.func @transform_4(%arg0: i32, %arg1: memref<8xi32, #tpu.memory_space<smem>>, %arg2: memref<1xi32, #tpu.memory_space<smem>>, %arg3: memref<8xi32, #tpu.memory_space<smem>>) -> (i32, i32) {
    %c0_i32 = arith.constant 0 : i32
    %c0_i32_0 = arith.constant 0 : i32
    return %c0_i32, %arg0 : i32, i32
  }
  func.func @transform_5(%arg0: i32, %arg1: memref<8xi32, #tpu.memory_space<smem>>, %arg2: memref<1xi32, #tpu.memory_space<smem>>, %arg3: memref<8xi32, #tpu.memory_space<smem>>) -> (i32, i32) {
    %c0_i32 = arith.constant 0 : i32
    %c0_i32_0 = arith.constant 0 : i32
    return %c0_i32, %arg0 : i32, i32
  }
  func.func @transform_6(%arg0: i32, %arg1: memref<8xi32, #tpu.memory_space<smem>>, %arg2: memref<1xi32, #tpu.memory_space<smem>>, %arg3: memref<8xi32, #tpu.memory_space<smem>>) -> (i32, i32) {
    %c0_i32 = arith.constant 0 : i32
    %c0_i32_0 = arith.constant 0 : i32
    return %c0_i32, %arg0 : i32, i32
  }
  func.func @transform_7(%arg0: i32, %arg1: memref<8xi32, #tpu.memory_space<smem>>, %arg2: memref<1xi32, #tpu.memory_space<smem>>, %arg3: memref<8xi32, #tpu.memory_space<smem>>) -> (i32, i32, i32) {
    %c0_i32 = arith.constant 0 : i32
    %c0_i32_0 = arith.constant 0 : i32
    %c0_i32_1 = arith.constant 0 : i32
    return %arg0, %c0_i32, %c0_i32_0 : i32, i32, i32
  }
}

</mosaic_0001>

<bundles_post_ra>
// kernel: tpu_custom_call.1
= control target key start
LH: loop header
LB: loop body
LE: loop exit
PB: predicated region body
PF: predicated region fallthrough
CT: control target
= control target key end

     0   :  { %s914_s0 = inlined_call_operand.vmem [shape: s32[8], index: 0, kind: input, shape index: {}]   ;;  %s915_s1 = inlined_call_operand.<no memory space> [shape: s32[1], index: 1, kind: input, shape index: {}]   ;;  %s916_s3 = inlined_call_operand.vmem [shape: s32[8,1], index: 3, kind: input, shape index: {}]   ;;  %s917_s4 = inlined_call_operand.vmem [shape: f32[8,1], index: 4, kind: input, shape index: {}]   ;;  %s918_s5 = inlined_call_operand.vmem [shape: f32[8,1], index: 5, kind: input, shape index: {}]   ;;  %s919_s6 = inlined_call_operand.vmem [shape: f32[8,32], index: 6, kind: input, shape index: {}]   ;;  %s920_s7 = inlined_call_operand.vmem [shape: s32[1,8], index: 7, kind: input, shape index: {}]   ;;  %s921_s8 = inlined_call_operand.vmem [shape: f32[1,8], index: 8, kind: input, shape index: {}]   ;;  %s922_s9 = inlined_call_operand.vmem [shape: f32[1,8], index: 9, kind: input, shape index: {}]   ;;  %s923_s10 = inlined_call_operand.hbm [shape: f32[1,1,128], index: 10, kind: output, shape index: {}]   ;;  %s924_s2 = inlined_call_operand.vmem [shape: s32[8], index: 2, kind: input, shape index: {}]  }
   0x1   :  { %s15_s14 = sshll.u32 %s914_s0, 4  ;;  %s20_s17 = sshll.u32 %s924_s2, 4  ;;  %s16_s14 = int_to_ptr.vmem [resolvable:$true] %s15_s14  ;;  %s21_s17 = int_to_ptr.vmem [resolvable:$true] %s20_s17 }
   0x2   :  { %s702_s18 = scalar_lea.vmem %s16_s14, 16  ;;  %p707_p1 = scmp.lt.s32.totalorder %s16_s14, %s16_s14 }
   0x3   :  { %p703_p0 = scmp.ne.s32.totalorder %s16_s14, %s702_s18  ;;  %p708_p2 = scmp.lt.s32.totalorder %s702_s18, %s702_s18 }
   0x5   :  { %p709_p3 = por %p708_p2, %p707_p1 }
   0x7   :  { %p710_p4 = pnand %p709_p3, %p703_p0 }
   0x9   :  { %713 = shalt.err (!%p710_p4)  }
   0xa   :  { %s774_s9 = smov [#allocation4]   ;;  %s714_s19 = scalar_lea.vmem %s21_s17, 16 }
   0xb   :  { %18 = dma.vmem_to_smem %s16_s14, 16, %s774_s9, [#allocation3] }
   0xc   :  { %p715_p5 = scmp.ne.s32.totalorder %s21_s17, %s714_s19  ;;  %p719_p6 = scmp.lt.s32.totalorder %s21_s17, %s21_s17 }
   0xd   :  { %p720_p7 = scmp.lt.s32.totalorder %s714_s19, %s714_s19 }
   0xf   :  { %p721_p8 = por %p720_p7, %p719_p6 }
  0x11   :  { %p722_p9 = pnand %p721_p8, %p715_p5 }
  0x13   :  { %725 = shalt.err (!%p722_p9)  }
  0x14   :  { %s775_s0 = smov [#allocation6]  }
  0x15   :  { %23 = dma.vmem_to_smem %s21_s17, 16, %s775_s0, [#allocation3] }
  0x16   :  { %758 = dma.done.wait [#allocation3], 32 }
  0x17   :  { %759 = vsyncadd [#allocation3], 4294967264 }
  0x18   :  { %25 = sfence }
  0x19   :  { %26 = vsyncpa [#allocation8], 0  ;;  %v43_v0 = vld [vmem:[%s919_s6] sm:$0xff]  ;;  %vm45_vm0 = vcmask 261120   ;;  %v776_v1 = vmov 0.0   ;;  %vm777_vm1 = vmmov 0   ;;  %v514_v16 = vlaneseq }
  0x1a   :  { %640 = vmatprep.subr.mxu0 %v776_v1  ;;  %v50_v2 = vsel %vm45_vm0, %v43_v0, 0  ;;  %642 = vmatprep.mubr.msk.f32.mxu0 %vm777_vm1, %v776_v1  ;;  %v498_v3 = vld [vmem:[%s917_s4] sm:$0xff]  ;;  %v778_v5 = vmov 0   ;;  %vm536_vm4 = vcmask 64512   ;;  %p626_p10 = scmp.le.s32.totalorder %s915_s1, 0  ;;  %v770_v60 = vmov 0.0  }
  0x1b   :  { %v83_v4 = vand.u32 4294901760, %v50_v2  ;;  %645 = vmatprep.subr.mxu1 %v776_v1  ;;  %647 = vmatprep.mubr.msk.f32.mxu1 %vm777_vm1, %v776_v1  ;;  %v524_v7 = vld [vmem:[%s916_s3] sm:$0xff]  ;;  %v869_v23 = vshrl.u32 %v514_v16, 7  ;;  %v874_v32 = vand.u32 127, %v514_v16  ;;  %s894_s26 = smov (!%p626_p10), 0  }
  0x1c   :  { %701 = vset.pattern.permute.xlu0 %v778_v5  ;;  %v624_v25 = vld [vmem:[%s921_s8] ss:$0 sm:$0xff] }
  0x1d   :  { %641 = vmatpush3.xpose.msra.mxu0 %v83_v4  ;;  %v119_v6 = vsub.f32 %v50_v2, %v83_v4  ;;  %502 = vperm.xlu0 %701, %v498_v3   ;;  %v531_v33 = vsub.s32 0, %v869_v23  ;;  %v880_v35 = vld [vmem:[%s920_s7] sm:$0x1]  ;;  %vm520_vm2 = vcmp.eq.s32.totalorder %v869_v23, %v874_v32 }
  0x1e   :  { %650 = vmatprep.subr.mxu0 %v776_v1 }
  0x1f   :  { %v120_v8 = vand.u32 4294901760, %v119_v6  ;;  %v532_v38 = vrot.slane %v880_v35, %v531_v33 }
  0x21   :  { %v121_v9 = vsub.f32 %v119_v6, %v120_v8  ;;  %527 = vperm.xlu0 %701, %v524_v7  }
  0x23   :  { %v122_v10 = vand.u32 4294901760, %v121_v9 }
  0x25   :  { %643 = vmatmul.mubr.f32.vlgmr.msra.gmra.mxu0 %v122_v10  ;;  %646 = vmatpush3.xpose.msra.mxu1 %v122_v10 }
  0x26   :  { %651 = vmatpush3.xpose.msra.mxu0 %v119_v6  ;;  %652 = vmatprep.mubr.msk.f32.mxu0 %vm777_vm1, %v776_v1 }
  0x27   :  { %655 = vmatprep.subr.mxu1 %v776_v1  ;;  %660 = vmatprep.subr.mxu0 %v776_v1 }
  0x28   :  { %648 = vmatmul.mubr.f32.vlgmr.msra.gmra.mxu1 %v83_v4 }
  0x29   :  { %653 = vmatmul.mubr.f32.vlgmr.msra.gmra.mxu0 %v119_v6  ;;  %656 = vmatpush3.xpose.msra.mxu1 %v83_v4 }
  0x2a   :  { %661 = vmatpush3.xpose.msra.mxu0 %v120_v8  ;;  %657 = vmatprep.mubr.msk.f32.mxu1 %vm777_vm1, %v776_v1 }
  0x2b   :  { %662 = vmatprep.mubr.msk.f32.mxu0 %vm777_vm1, %v776_v1  ;;  %665 = vmatprep.subr.mxu1 %v776_v1 }
  0x2c   :  { %658 = vmatmul.mubr.f32.vlgmr.msra.gmra.mxu1 %v120_v8 }
  0x2d   :  { %663 = vmatmul.mubr.f32.vlgmr.msra.gmra.mxu0 %v83_v4  ;;  %666 = vmatpush3.xpose.msra.mxu1 %v83_v4 }
  0x2e   :  { %667 = vmatprep.mubr.msk.f32.mxu1 %vm777_vm1, %v776_v1 }
  0x30   :  { %668 = vmatmul.mubr.f32.vlgmr.msra.gmra.mxu1 %v83_v4 }
  0x98   :  { %v503_v28 = vpop.permute.xlu0 %502 }
  0x99   :  { %v511_v30 = vadd.f32 %v624_v25, %v503_v28 }
  0x9c   :  { %v528_v39 = vpop.permute.xlu0 %527 }
  0x9d   :  { %vm533_vm6 = vcmp.ne.s32.totalorder %v528_v39, %v532_v38 }
  0x9e   :  { %v625_v50 = vsel %vm533_vm6, 1.0, %v776_v1 }
  0xe5   :  { %v124_v11 = vpop.f32.mrf.mxu0 }
  0xe7   :  { %v644_v12 = vpop.f32.mrf.mxu0 }
  0xe8   :  { %v200_v13 = vpop.f32.mrf.mxu1 }
  0xe9   :  { %v201_v14 = vadd.f32 %v200_v13, %v124_v11  ;;  %v274_v15 = vpop.f32.mrf.mxu0 }
  0xea   :  { %v649_v17 = vpop.f32.mrf.mxu1 }
  0xeb   :  { %v275_v18 = vadd.f32 %v274_v15, %v201_v14  ;;  %v654_v19 = vpop.f32.mrf.mxu0 }
  0xec   :  { %v348_v20 = vpop.f32.mrf.mxu1 }
  0xed   :  { %v349_v21 = vadd.f32 %v348_v20, %v275_v18  ;;  %v422_v22 = vpop.f32.mrf.mxu0 }
  0xee   :  { %v659_v24 = vpop.f32.mrf.mxu1 }
  0xef   :  { %v423_v26 = vadd.f32 %v422_v22, %v349_v21  ;;  %v664_v27 = vpop.f32.mrf.mxu0 }
  0xf0   :  { %v494_v29 = vpop.f32.mrf.mxu1 }
  0xf1   :  { %v495_v31 = vadd.f32 %v494_v29, %v423_v26 }
  0xf2   :  { %v669_v34 = vpop.f32.mrf.mxu1 }
  0xf3   :  { %v512_v36 = vmul.f32 2.0, %v495_v31 }
  0xf5   :  { %v513_v37 = vsub.f32 %v511_v30, %v512_v36 }
  0xf7   :  { %vm521_vm3 = vcmp.le.f32.partialorder %v513_v37, 0.0 }
  0xf8   :  { %vm522_vm5 = vmor %vm521_vm3, %vm520_vm2 }
  0xf9   :  { %v523_v40 = vsel %vm522_vm5, 0.0, %v513_v37 }
  0xfa   :  { %v537_v41 = vsel %vm536_vm4, %v523_v40, inf  ;;  %v554_v42 = vsel %vm533_vm6, %v523_v40, inf  ;;  %555 = vst.msk [vmem:[#allocation2] sm:$0xff] %vm536_vm4, %v523_v40 }
  0xfb   :  { %v538_v43 = vrot.slane %v537_v41, 4 }
  0xfd   :  { %v539_v44 = vmin.f32 %v537_v41, %v538_v43 }
  0xff   :  { %v540_v45 = vrot.slane %v539_v44, 2 }
 0x101   :  { %v541_v46 = vmin.f32 %v539_v44, %v540_v45 }
 0x103   :  { %v542_v47 = vrot.slane %v541_v46, 1 }
 0x105   :  { %v543_v48 = vmin.f32 %v541_v46, %v542_v47 }
 0x107   :  { %v544_v49 = vsub.f32 %v523_v40, %v543_v48 }
 0x109   :  { %v545_v51 = vmul.f32 %v625_v50, %v544_v49 }
 0x10b   :  { %v546_v52 = vsel %vm536_vm4, %v545_v51, -inf }
 0x10c   :  { %v547_v53 = vrot.slane %v546_v52, 4 }
 0x10e   :  { %v548_v54 = vmax.f32 %v546_v52, %v547_v53 }
 0x110   :  { %v549_v55 = vrot.slane %v548_v54, 2 }
 0x112   :  { %v550_v56 = vmax.f32 %v548_v54, %v549_v55 }
 0x114   :  { %v551_v57 = vrot.slane %v550_v56, 1  ;;  %619 = sbr.rel (%p626_p10) target bundleno = 318 (0x13e), region = 51 }
 0x116   :  { %v552_v58 = vmax.f32 %v550_v56, %v551_v57 }
 0x118   :  { %v553_v59 = vadd.f32 %v552_v58, %v543_v48 }
 0x119   :  { %v762_v61 = vmov 0.0  }
 0x11a LB: > { %s565_s27 = sld [smem:[#allocation6 + %s768_s26]]  ;;  %v779_v12 = vmov 0.0   ;;  %s560_s26 = sadd.s32 1, %s768_s26   ;;  %s768_s26 = sphi %s894_s26, %s560_s26   ;;  %v764_v61 = vphi %v762_v61, %v763_v61  }
 0x11b   : > { %p559_p11 = scmp.ge.s32.totalorder %s560_s26, %s915_s1 }
 0x120   : > { %s566_s28 = scalar_lea.vmem [#allocation2], %s565_s27  ;;  %s583_s29 = sld [smem:[#allocation4 + %s565_s27]]  ;;  %v586_v6 = vstv %s565_s27 }
 0x121   : > { %v567_v62 = vld [vmem:[%s566_s28] sm:$0x1]  ;;  %vm587_vm9 = vcmp.ne.s32.totalorder %v874_v32, %v586_v6 }
 0x122   : > { %v571_v63 = vrot.slane %v567_v62, %v531_v33  ;;  %v591_v10 = vadd.f32 1.0, %v567_v62 }
 0x124   : > { %vm572_vm7 = vcmp.gt.f32.partialorder %v554_v42, %v571_v63 }
 0x125   : > { %v573_v0 = vsel %vm572_vm7, %v554_v42, inf }
 0x126   : > { %v574_v1 = vsel %vm536_vm4, %v573_v0, inf  ;;  %v584_v5 = vstv %s583_s29 }
 0x127   : > { %v575_v2 = vrot.slane %v574_v1, 4  ;;  %vm585_vm8 = vcmp.eq.s32.totalorder %v584_v5, %v880_v35 }
 0x128   : > { %vm588_vm10 = vmand %vm585_vm8, %vm587_vm9 }
 0x129   : > { %v576_v3 = vmin.f32 %v574_v1, %v575_v2  ;;  %v627_v13 = vsel %vm588_vm10, 1.0, %v779_v12 }
 0x12b   : > { %v577_v4 = vrot.slane %v576_v3, 2 }
 0x12d   : > { %v578_v7 = vmin.f32 %v576_v3, %v577_v4 }
 0x12f   : > { %v579_v8 = vrot.slane %v578_v7, 1 }
 0x131   : > { %v580_v9 = vmin.f32 %v578_v7, %v579_v8 }
 0x133   : > { %vm581_vm11 = vcmp.lt.f32.partialorder %v580_v9, inf }
 0x134   : > { %v582_v11 = vsel %vm581_vm11, %v580_v9, %v553_v59 }
 0x135   : > { %v592_v14 = vsub.f32 %v591_v10, %v582_v11 }
 0x137   : > { %v593_v15 = vmul.f32 %v627_v13, %v592_v14 }
 0x139   : > { %v594_v16 = vmax.f32 %v593_v15, 0.0  ;;  %562 = sbr.rel (!%p559_p11) target bundleno = 282 (0x11a), region = 57 }
 0x13b   : > { %v595_v17 = vadd.f32 %v764_v61, %v594_v16  }
 0x13d   : > { %v763_v61 = vmov %v595_v17   ;;  %v771_v60 = vmov (%p559_p11), %v595_v17  }
 0x13e PF:  { %vm596_vm12 = vcmask 57344   ;;  %s780_s12 = smov [#allocation7]   ;;  %v772_v60 = vphi %v770_v60, %v771_v60  }
 0x13f   :  { %v597_v18 = vsel %vm596_vm12, %v772_v60, 0.0  ;;  %s607_s13 = sshll.u32 %s780_s12, 4  ;;  %s608_s13 = int_to_ptr.vmem [resolvable:$true] %s607_s13 }
 0x140   :  { %598 = vadd.xlane.f32.xlu0 %v597_v18  ;;  %s726_s5 = scalar_lea.vmem %s608_s13, 16  ;;  %s730_s14 = scalar_lea.vmem %s608_s13, 32 }
 0x141   :  { %p727_p12 = scmp.ne.s32.totalorder %s608_s13, %s726_s5  ;;  %p731_p13 = scmp.lt.s32.totalorder %s608_s13, %s608_s13 }
 0x142   :  { %p732_p0 = scmp.lt.s32.totalorder %s730_s14, %s726_s5 }
 0x144   :  { %p733_p1 = por %p732_p0, %p731_p13 }
 0x146   :  { %p734_p2 = pnand %p733_p1, %p727_p12 }
 0x1c9   :  { %v599_v19 = vpop.xlane.xlu0 %598 }
 0x1ca   :  { %600 = vst [vmem:[#allocation7] sm:$0x1] %v599_v19 }
 0x1cb   :  { %737 = shalt.err (!%p734_p2)
}
 0x1cc   :  { %610 = dma.vmem_to_hbm [thread:$0]  %s608_s13, 16, %s923_s10, [#allocation8]  }
 0x1cd   :  { %760 = dma.done.wait [#allocation8], 16  }
 0x1ce   :  { %761 = vsyncadd [#allocation8], 4294967280 }
 0x1cf   :  { %614 = vsyncpa [#allocation8], 1 }

</bundles_post_ra>
